<compile_context>
chip_gen: v6e
topology: v6e:2x2x1
jax: 0.10.0
libtpu: 0.0.40
codegen_flags: <defaults>
</compile_context>

<pallas_src>
import functools

import jax
import jax.numpy as jnp
from jax.experimental import pallas as pl
from jax.experimental.pallas import tpu as pltpu


def _round_up(n, m):
    return (n + m - 1) // m * m


# ------------------------------- Pallas kernel ------------------------------ #

def _crop1d_kernel(x_ref, o_ref, *, crop):
    # x_ref: (row_tile, L) ; o_ref: (row_tile, L - 2*crop)
    # Static lane slice -> one shifted read, one full-slab store per grid step.
    o_ref[...] = x_ref[:, crop:crop + o_ref.shape[1]]


# ------------------------------- forward pass ------------------------------- #

def crop1d_forward(x, crop_size):
    """x: (B, C, L) -> x[:, :, crop_size : L - crop_size] via a Pallas copy kernel."""
    B, C, L = x.shape
    L_out = L - 2 * crop_size
    assert L_out > 0, "crop_size too large for input length"

    rows = B * C
    x2d = x.reshape(rows, L)

    # Pad the row (sublane / M) axis to a multiple of 8 so stores are unmasked;
    # pick a row tile that divides the padded row count.
    row_tile = min(512, _round_up(rows, 8))
    rows_pad = _round_up(rows, row_tile)
    if rows_pad != rows:
        x2d = jnp.pad(x2d, ((0, rows_pad - rows), (0, 0)))

    grid = (rows_pad // row_tile,)

    # Double-buffered input + output blocks, plus headroom.
    bytes_per_elt = x.dtype.itemsize
    vmem_bytes = 2 * row_tile * (L + L_out) * bytes_per_elt + (1 << 20)
    vmem_bytes = max(int(vmem_bytes), 4 << 20)

    out = pl.pallas_call(
        functools.partial(_crop1d_kernel, crop=crop_size),
        out_shape=jax.ShapeDtypeStruct((rows_pad, L_out), x.dtype),
        grid=grid,
        in_specs=[pl.BlockSpec((row_tile, L), lambda i: (i, 0))],
        out_specs=pl.BlockSpec((row_tile, L_out), lambda i: (i, 0)),
        compiler_params=pltpu.CompilerParams(
            dimension_semantics=("parallel",),
            vmem_limit_bytes=vmem_bytes,
        ),
    )(x2d)

    return out[:rows].reshape(B, C, L_out)


# ---------------------------- pure-JAX reference ---------------------------- #

def crop1d_reference(x, crop_size):
    end = -crop_size if crop_size != 0 else None
    return x[:, :, crop_size:end]


# ----------------------------------- main ------------------------------------ #

if __name__ == "__main__":
    key = jax.random.PRNGKey(0)
    crop_size = 4  # Crop1d(4) as used in the lunar_vae decoder

    k1, k2 = jax.random.split(key)
    # Small shapes consistent with the module: (batch, channels, length).
    x1 = jax.random.normal(k1, (2, 4, 64), jnp.float32)
    # Second case: rows = 3*5 = 15 (not a multiple of 8) exercises the padding path.
    x2 = jax.random.normal(k2, (3, 5, 40), jnp.float32)

    for x in (x1, x2):
        out = jax.block_until_ready(crop1d_forward(x, crop_size))
        ref = jax.block_until_ready(crop1d_reference(x, crop_size))
        assert out.shape == ref.shape, (out.shape, ref.shape)
        if not jnp.array_equal(out, ref):
            raise RuntimeError("Pallas Crop1d does not match reference")

    print("KERNEL_OK")
</pallas_src>

<mosaic_0001>
module attributes {stable_mosaic.version = 11 : i64} {
  func.func @_crop1d_kernel(%arg0: i32, %arg1: memref<8x64xf32, #tpu.memory_space<vmem>>, %arg2: memref<8x56xf32, #tpu.memory_space<vmem>>) attributes {dimension_semantics = [#tpu.dimension_semantics<parallel>], iteration_bounds = array<i64: 1>, scalar_prefetch = 0 : i64, scratch_operands = 0 : i64, tpu.core_type = #tpu.core_type<tc>, window_params = [{transform_indices = @transform_0, window_bounds = array<i64: 8, 64>}, {transform_indices = @transform_1, window_bounds = array<i64: 8, 56>}]} {
    %c0 = arith.constant 0 : index
    %c4 = arith.constant 4 : index
    %0 = vector.load %arg1[%c0, %c4] : memref<8x64xf32, #tpu.memory_space<vmem>>, vector<8x56xf32>
    %c0_0 = arith.constant 0 : index
    %c0_1 = arith.constant 0 : index
    %1 = vector.load %arg2[%c0_0, %c0_1] : memref<8x56xf32, #tpu.memory_space<vmem>>, vector<8x56xf32>
    tpu.vector_store %arg2[%c0_0, %c0_1], %0 {strides = array<i32>} : memref<8x56xf32, #tpu.memory_space<vmem>>, vector<8x56xf32>,
    return
  }
  func.func @transform_0(%arg0: i32) -> (i32, i32) {
    %c0_i32 = arith.constant 0 : i32
    %c0_i32_0 = arith.constant 0 : i32
    return %arg0, %c0_i32 : i32, i32
  }
  func.func @transform_1(%arg0: i32) -> (i32, i32) {
    %c0_i32 = arith.constant 0 : i32
    %c0_i32_0 = arith.constant 0 : i32
    return %arg0, %c0_i32 : i32, i32
  }
}

</mosaic_0001>

<bundles_post_ra>
// kernel: tpu_custom_call.1
= control target key start
LH: loop header
LB: loop body
LE: loop exit
PB: predicated region body
PF: predicated region fallthrough
CT: control target
= control target key end

     0   :  { %6 = vsyncpa [#allocation3], 0  ;;  %s109_s0 = inlined_call_operand.hbm [shape: f32[8,64], index: 0, kind: input, shape index: {}]   ;;  %s110_s1 = inlined_call_operand.hbm [shape: f32[8,56], index: 1, kind: output, shape index: {}]  }
   0x1   :  { %7 = vsyncpa [#allocation4], 0  ;;  %s90_s6 = smov [#allocation2]  }
   0x2   :  { %s14_s7 = sshll.u32 %s90_s6, 4  ;;  %s15_s7 = int_to_ptr.vmem [resolvable:$true] %s14_s7 }
   0x3   :  { %s54_s8 = scalar_lea.vmem %s15_s7, 128  ;;  %p59_p1 = scmp.lt.s32.totalorder %s15_s7, %s15_s7 }
   0x4   :  { %p55_p0 = scmp.ne.s32.totalorder %s15_s7, %s54_s8  ;;  %p60_p2 = scmp.lt.s32.totalorder %s54_s8, %s54_s8 }
   0x6   :  { %p61_p3 = por %p60_p2, %p59_p1 }
   0x8   :  { %p62_p4 = pnand %p61_p3, %p55_p0 }
   0xa   :  { %65 = shalt.err (!%p62_p4)
}
   0xb   :  { %17 = dma.hbm_to_vmem [thread:$0]  %s109_s0, 128, %s15_s7, [#allocation3]  }
   0xc   :  { %86 = dma.done.wait [#allocation3], 128  }
   0xd   :  { %87 = vsyncadd [#allocation3], 4294967168  ;;  %v21_v0 = vld [vmem:[#allocation2] sm:$0xff]  ;;  %s91_s11 = smov 124   ;;  %s92_s12 = smov [#allocation5]   ;;  %vm26_vm0 = vcmask 457728  }
   0xe   :  { %23 = vrot.lane.b32.xlu0 %v21_v0, %s91_s11  ;;  %s34_s13 = sshll.u32 %s92_s12, 4  ;;  %s35_s13 = int_to_ptr.vmem [resolvable:$true] %s34_s13 }
   0xf   :  { %s66_s14 = scalar_lea.vmem %s35_s13, 128  ;;  %p71_p6 = scmp.lt.s32.totalorder %s35_s13, %s35_s13 }
  0x10   :  { %p67_p5 = scmp.ne.s32.totalorder %s35_s13, %s66_s14  ;;  %p72_p7 = scmp.lt.s32.totalorder %s66_s14, %s66_s14 }
  0x12   :  { %p73_p8 = por %p72_p7, %p71_p6 }
  0x14   :  { %p74_p9 = pnand %p73_p8, %p67_p5 }
  0x80   :  { %v24_v1 = vpop.permute.xlu0 %23 }
  0x81   :  { %27 = vst.msk [vmem:[#allocation5] sm:$0xff] %vm26_vm0, %v24_v1 }
  0x82   :  { %77 = shalt.err (!%p74_p9)
}
  0x83   :  { %37 = dma.vmem_to_hbm [thread:$0]  %s35_s13, 128, %s110_s1, [#allocation4]  }
  0x84   :  { %88 = dma.done.wait [#allocation4], 128  }
  0x85   :  { %89 = vsyncadd [#allocation4], 4294967168 }
  0x86   :  { %41 = vsyncpa [#allocation3], 1 }
  0x87   :  { %42 = vsyncpa [#allocation4], 1 }

</bundles_post_ra>
